<compile_context>
chip_gen: v5e
topology: v5e:2x2
jax: 0.10.0
libtpu: 0.0.40
codegen_flags: <defaults>
</compile_context>

<pallas_src>
import functools

import jax
import jax.numpy as jnp
from jax.experimental import pallas as pl
from jax.experimental.pallas import tpu as pltpu

EPS = 1e-5        # PyTorch BatchNorm1d default eps
VPAD = 128        # lane width of the fused layer-1 operand (cont lanes + offset vocab)
NC_PAD = 8        # continuous features occupy lanes [0, NC_PAD); vocab starts at NC_PAD
CAT_BITS = 8      # bits per packed categorical field (offset indices must be < 256)


# ----------------------------------------------------------------------------
# Pallas kernel: fused (one-hot vocab | bn_cont) matmul -> ReLU -> Linear/ReLU -> Linear
# (all BatchNorm affines pre-folded into the weights in the wrapper)
# ----------------------------------------------------------------------------
def tabular_mlp_kernel(catp_ref, cont_ref,
                       t1_ref, b1_ref,
                       w2_ref, b2_ref,
                       w3_ref, b3_ref,
                       out_ref, *, n_cat):
    tb = catp_ref.shape[0]

    # --- unpack the packed categorical indices and build the multi-hot lanes ----------
    packed = catp_ref[...]                                            # [TB, 1] int32
    lanes = jax.lax.broadcasted_iota(jnp.int32, (tb, VPAD), 1)        # lane-dense iota
    hit = lanes == (packed & 0xFF)
    for c in range(1, n_cat):                                         # static, tiny loop
        hit = jnp.logical_or(hit, lanes == ((packed >> (CAT_BITS * c)) & 0xFF))

    # --- place bn-folded continuous feats in lanes [0, NC_PAD) and fuse with one-hot ---
    cont = cont_ref[...]                                              # [TB, NC_PAD] bf16
    cont_full = jnp.concatenate(
        [cont, jnp.zeros((tb, VPAD - NC_PAD), cont.dtype)], axis=1)   # [TB, 128]
    act = jnp.where(hit, jnp.ones_like(cont_full), cont_full)         # [TB, 128] bf16
    # (vocab indices are >= NC_PAD, so one-hot lanes never collide with cont lanes)

    # --- layer 1: single fused matmul (embeddings + bn_cont + W1 folded into T) --------
    h1 = jnp.dot(act, t1_ref[...], preferred_element_type=jnp.float32) + b1_ref[...]
    h1 = jnp.maximum(h1, 0.0)

    # --- layer 2 (BN1 folded into W2'/b2') ----------------------------------------------
    h2 = jnp.dot(h1.astype(jnp.bfloat16), w2_ref[...],
                 preferred_element_type=jnp.float32) + b2_ref[...]
    h2 = jnp.maximum(h2, 0.0)

    # --- output layer (BN2 folded into W3'/b3') -----------------------------------------
    out = jnp.dot(h2.astype(jnp.bfloat16), w3_ref[...],
                  preferred_element_type=jnp.float32) + b3_ref[...]
    out_ref[...] = out.astype(out_ref.dtype)


def _round_up(x, m):
    return (x + m - 1) // m * m


def run_tabular_mlp(cat_packed, cont, t1, b1, w2, b2, w3, b3, *, n_cat, tb=2048):
    """Batch-tiled pallas_call: inputs/output tiled along batch, weights resident."""
    B = cat_packed.shape[0]
    h1, h2 = w2.shape[0], w3.shape[0]
    out_sz = w3.shape[1]

    # Large tile for HBM-roofline efficiency, but keep >=~4 grid steps so the pipeline
    # double-buffers and the grid shards across both TensorCores on v7x.
    tb = max(8, _round_up(tb, 8))
    tb = min(tb, max(8, _round_up(pl.cdiv(B, 4), 8)))
    n_blocks = pl.cdiv(B, tb)          # ragged last block handled by Pallas (masked store)

    tiled = lambda cols: pl.BlockSpec((tb, cols), lambda i: (i, 0))
    resident = lambda arr: pl.BlockSpec(arr.shape, lambda i: (0, 0))

    flops = 2 * B * (VPAD * h1 + h1 * h2 + h2 * out_sz)
    bytes_accessed = (B * (4 + 2 * NC_PAD + 4 * out_sz)
                      + 2 * (t1.size + w2.size + w3.size)
                      + 4 * (b1.size + b2.size + b3.size))

    return pl.pallas_call(
        functools.partial(tabular_mlp_kernel, n_cat=n_cat),
        out_shape=jax.ShapeDtypeStruct((B, out_sz), jnp.float32),
        grid=(n_blocks,),
        in_specs=[
            tiled(1),            # packed (offset) categorical indices  [B, 1] int32
            tiled(NC_PAD),       # continuous feats (bf16, 8 lanes)     [B, 8]
            resident(t1),        # fused layer-1 table                  [128, H1] bf16
            resident(b1),        # [1, H1] f32 (bn_cont shift folded)
            resident(w2),        # [H1, H2] bf16 (BN1 folded)
            resident(b2),        # [1, H2] f32
            resident(w3),        # [H2, out] bf16 (BN2 folded)
            resident(b3),        # [1, out] f32
        ],
        out_specs=tiled(out_sz),
        compiler_params=pltpu.CompilerParams(
            dimension_semantics=("parallel",)),
        cost_estimate=pl.CostEstimate(
            flops=flops, transcendentals=0, bytes_accessed=bytes_accessed),
    )(cat_packed, cont, t1, b1, w2, b2, w3, b3)


# ----------------------------------------------------------------------------
# Parameter construction (deterministic) + BN/embedding folding in plain JAX
# ----------------------------------------------------------------------------
def init_params(key, emb_szs, n_cont, out_sz, layers):
    ks = jax.random.split(key, 32)
    ki = iter(ks)
    p = {}
    p["emb_tables"] = [jax.random.normal(next(ki), (ni, nf), jnp.float32) * 0.1
                       for ni, nf in emb_szs]
    n_emb = sum(nf for _, nf in emb_szs)
    n_in = n_emb + n_cont

    p["bn_cont"] = dict(
        gamma=jax.random.normal(next(ki), (n_cont,), jnp.float32) * 0.1 + 1.0,
        beta=jax.random.normal(next(ki), (n_cont,), jnp.float32) * 0.1,
        mean=jax.random.normal(next(ki), (n_cont,), jnp.float32) * 0.1,
        var=jax.random.uniform(next(ki), (n_cont,), jnp.float32, 0.5, 1.5),
    )

    p["linears"], p["bns"] = [], []
    dims = [n_in] + list(layers)
    for i, h in enumerate(layers):
        fan_in = dims[i]
        w = jax.random.normal(next(ki), (fan_in, h), jnp.float32) / jnp.sqrt(fan_in)
        b = jax.random.normal(next(ki), (h,), jnp.float32) * 0.01
        p["linears"].append((w, b))
        p["bns"].append(dict(
            gamma=jax.random.normal(next(ki), (h,), jnp.float32) * 0.1 + 1.0,
            beta=jax.random.normal(next(ki), (h,), jnp.float32) * 0.1,
            mean=jax.random.normal(next(ki), (h,), jnp.float32) * 0.1,
            var=jax.random.uniform(next(ki), (h,), jnp.float32, 0.5, 1.5),
        ))
    w_out = jax.random.normal(next(ki), (layers[-1], out_sz), jnp.float32) / jnp.sqrt(layers[-1])
    b_out = jax.random.normal(next(ki), (out_sz,), jnp.float32) * 0.01
    p["out_linear"] = (w_out, b_out)
    p["n_emb"], p["n_cont"] = n_emb, n_cont
    return p


def fold_bn(bn):
    scale = bn["gamma"] / jnp.sqrt(bn["var"] + EPS)
    shift = bn["beta"] - bn["mean"] * scale
    return scale, shift


def fold_params(params):
    """Fold embeddings, bn_cont and the hidden BatchNorms into the Linear weights.

    Exact in f32 (each affine precedes the next matmul; ReLU order preserved).
    Matmul operands are then cast to bf16 for the kernel; biases stay f32.
    """
    n_emb, n_cont = params["n_emb"], params["n_cont"]
    (w1, b1), (w2, b2) = params["linears"]
    w3, b3 = params["out_linear"]
    h1 = w1.shape[1]

    # --- layer 1: split W1 into embedding / continuous blocks ------------------
    w1_emb, w1_cont = w1[:n_emb], w1[n_emb:]
    c_scale, c_shift = fold_bn(params["bn_cont"])
    w1c = c_scale[:, None] * w1_cont                 # diag(c_scale) @ W1_cont
    b1f = b1 + c_shift @ w1_cont

    # fused per-table contribution blocks T_i = E_i @ W1_emb[block_i]
    t_rows, vocab_offsets = [], []
    feat_off, vocab_off = 0, NC_PAD                  # vocab lanes start after cont lanes
    for tbl in params["emb_tables"]:
        ni, nf = tbl.shape
        t_rows.append(tbl @ w1_emb[feat_off:feat_off + nf])    # [ni, H1]
        vocab_offsets.append(vocab_off)
        feat_off += nf
        vocab_off += ni
    assert vocab_off <= VPAD, "combined vocab + cont lanes must fit in 128 lanes"
    assert vocab_off <= (1 << CAT_BITS), "offset indices must fit in a packed field"
    assert len(t_rows) * CAT_BITS <= 31, "packed categorical fields must fit in int32"

    # single fused layer-1 table: rows [0, n_cont) = bn-folded cont weights,
    # rows [NC_PAD, NC_PAD+sum(ni)) = embedding contributions, other rows zero.
    t1 = jnp.zeros((VPAD, h1), jnp.float32)
    t1 = t1.at[:n_cont].set(w1c)
    t1 = t1.at[NC_PAD:vocab_off].set(jnp.concatenate(t_rows, axis=0))

    # --- fold hidden BatchNorms into the NEXT Linear ----------------------------
    s1, sh1 = fold_bn(params["bns"][0])
    s2, sh2 = fold_bn(params["bns"][1])
    w2f, b2f = s1[:, None] * w2, b2 + sh1 @ w2
    w3f, b3f = s2[:, None] * w3, b3 + sh2 @ w3

    return dict(
        t1=t1.astype(jnp.bfloat16),
        b1=b1f[None, :].astype(jnp.float32),
        w2=w2f.astype(jnp.bfloat16), b2=b2f[None, :].astype(jnp.float32),
        w3=w3f.astype(jnp.bfloat16), b3=b3f[None, :].astype(jnp.float32),
        vocab_offsets=jnp.asarray(vocab_offsets, jnp.int32),
        n_cat=len(t_rows), n_cont=n_cont,
    )


def pack_inputs(folded, x_cat, x_cont):
    """Pack offset categorical indices into one int32/row; cont -> bf16, 8 lanes."""
    idx = x_cat.astype(jnp.int32) + folded["vocab_offsets"][None, :]   # offsets incl. base
    shifts = (jnp.arange(idx.shape[1], dtype=jnp.int32) * CAT_BITS)[None, :]
    cat_packed = jnp.sum(idx << shifts, axis=1, keepdims=True).astype(jnp.int32)
    cont = jnp.pad(x_cont.astype(jnp.bfloat16),
                   ((0, 0), (0, NC_PAD - x_cont.shape[1])))
    return cat_packed, cont


def tabular_forward(params, x_cat, x_cont, *, folded=None, tb=2048):
    if folded is None:
        folded = fold_params(params)
    cat_packed, cont = pack_inputs(folded, x_cat, x_cont)
    return run_tabular_mlp(
        cat_packed, cont,
        folded["t1"], folded["b1"], folded["w2"], folded["b2"],
        folded["w3"], folded["b3"],
        n_cat=folded["n_cat"], tb=tb)


# ----------------------------------------------------------------------------
# References for verification
# ----------------------------------------------------------------------------
def reference_forward(params, x_cat, x_cont):
    """Pure-JAX f32 reference mirroring the PyTorch eval-mode forward."""
    embs = [jnp.take(tbl, x_cat[:, i], axis=0) for i, tbl in enumerate(params["emb_tables"])]
    x = jnp.concatenate(embs, axis=1)                      # emb_drop: identity (eval)
    bc = params["bn_cont"]
    xc = bc["gamma"] * (x_cont - bc["mean"]) / jnp.sqrt(bc["var"] + EPS) + bc["beta"]
    x = jnp.concatenate([x, xc], axis=1)
    for (w, b), bn in zip(params["linears"], params["bns"]):
        x = jnp.maximum(x @ w + b, 0.0)
        x = bn["gamma"] * (x - bn["mean"]) / jnp.sqrt(bn["var"] + EPS) + bn["beta"]
    w, b = params["out_linear"]
    return x @ w + b


def folded_bf16_reference(folded, x_cat, x_cont):
    """Pure-JAX forward using exactly the folded bf16 params / act the kernel sees."""
    idx = x_cat.astype(jnp.int32) + folded["vocab_offsets"][None, :]
    lanes = jnp.arange(VPAD, dtype=jnp.int32)[None, None, :]
    hit = (lanes == idx[:, :, None]).any(axis=1)                        # [B, 128]
    cont = jnp.pad(x_cont.astype(jnp.bfloat16),
                   ((0, 0), (0, VPAD - x_cont.shape[1])))
    act = jnp.where(hit, jnp.ones_like(cont), cont)
    h1 = jnp.maximum(jnp.dot(act, folded["t1"],
                             preferred_element_type=jnp.float32) + folded["b1"], 0.0)
    h2 = jnp.maximum(jnp.dot(h1.astype(jnp.bfloat16), folded["w2"],
                             preferred_element_type=jnp.float32) + folded["b2"], 0.0)
    return jnp.dot(h2.astype(jnp.bfloat16), folded["w3"],
                   preferred_element_type=jnp.float32) + folded["b3"]


if __name__ == "__main__":
    emb_szs = [(24, 12), (2, 1), (7, 4)]
    n_cont, out_sz, layers = 6, 2, [32, 16]
    B = 100       # non-multiple of the tile: exercises the masked ragged last block

    key = jax.random.PRNGKey(0)
    k_par, k_cat, k_cont = jax.random.split(key, 3)
    params = init_params(k_par, emb_szs, n_cont, out_sz, layers)

    cat_cols = []
    for i, (ni, _) in enumerate(emb_szs):
        cat_cols.append(jax.random.randint(jax.random.fold_in(k_cat, i), (B, 1), 0, ni, jnp.int32))
    x_cat = jnp.concatenate(cat_cols, axis=1)                  # [B, 3] int32
    x_cont = jax.random.normal(k_cont, (B, n_cont), jnp.float32)

    folded = fold_params(params)
    out = tabular_forward(params, x_cat, x_cont, folded=folded)   # auto tile selection
    out = jax.block_until_ready(out)
    assert out.shape == (B, out_sz)

    # Tight check: kernel vs pure-JAX forward with the identical folded bf16 params.
    ref_bf16 = folded_bf16_reference(folded, x_cat, x_cont)
    assert jnp.allclose(out, ref_bf16, atol=2e-3, rtol=2e-3), \
        "Pallas output mismatch vs folded-bf16 reference"

    # Semantic check: vs the f32 PyTorch-eval-mode reference (looser: bf16 weights/acts).
    ref_f32 = reference_forward(params, x_cat, x_cont)
    assert jnp.allclose(out, ref_f32, atol=5e-2, rtol=5e-2), \
        "Pallas output mismatch vs f32 reference"

    print("KERNEL_OK")
</pallas_src>

<mosaic_0001>
module attributes {stable_mosaic.version = 11 : i64} {
  func.func @tabular_mlp_kernel(%arg0: i32, %arg1: memref<32x1xi32, #tpu.memory_space<vmem>>, %arg2: memref<32x8xbf16, #tpu.memory_space<vmem>>, %arg3: memref<128x32xbf16, #tpu.memory_space<vmem>>, %arg4: memref<1x32xf32, #tpu.memory_space<vmem>>, %arg5: memref<32x16xbf16, #tpu.memory_space<vmem>>, %arg6: memref<1x16xf32, #tpu.memory_space<vmem>>, %arg7: memref<16x2xbf16, #tpu.memory_space<vmem>>, %arg8: memref<1x2xf32, #tpu.memory_space<vmem>>, %arg9: memref<32x2xf32, #tpu.memory_space<vmem>>) attributes {dimension_semantics = [#tpu.dimension_semantics<parallel>], iteration_bounds = array<i64: 4>, scalar_prefetch = 0 : i64, scratch_operands = 0 : i64, tpu.core_type = #tpu.core_type<tc>, window_params = [{transform_indices = @transform_0, window_bounds = array<i64: 32, 1>}, {transform_indices = @transform_1, window_bounds = array<i64: 32, 8>}, {pipeline_mode = #tpu.pipeline_mode<synchronous>, transform_indices = @transform_2, window_bounds = array<i64: 128, 32>}, {pipeline_mode = #tpu.pipeline_mode<synchronous>, transform_indices = @transform_3, window_bounds = array<i64: 1, 32>}, {pipeline_mode = #tpu.pipeline_mode<synchronous>, transform_indices = @transform_4, window_bounds = array<i64: 32, 16>}, {pipeline_mode = #tpu.pipeline_mode<synchronous>, transform_indices = @transform_5, window_bounds = array<i64: 1, 16>}, {pipeline_mode = #tpu.pipeline_mode<synchronous>, transform_indices = @transform_6, window_bounds = array<i64: 16, 2>}, {pipeline_mode = #tpu.pipeline_mode<synchronous>, transform_indices = @transform_7, window_bounds = array<i64: 1, 2>}, {transform_indices = @transform_8, window_bounds = array<i64: 32, 2>}]} {
    %c0 = arith.constant 0 : index
    %c0_0 = arith.constant 0 : index
    %0 = vector.load %arg1[%c0, %c0_0] : memref<32x1xi32, #tpu.memory_space<vmem>>, vector<32x1xi32>
    %1 = tpu.iota {dimensions = array<i32: 1>} : vector<32x128xi32>
    %c255_i32 = arith.constant 255 : i32
    %2 = vector.broadcast %c255_i32 : i32 to vector<32x1xi32>
    %3 = arith.andi %0, %2 : vector<32x1xi32>
    %4 = vector.broadcast %3 : vector<32x1xi32> to vector<32x128xi32>
    %5 = arith.cmpi eq, %1, %4 : vector<32x128xi32>
    %c8_i32 = arith.constant 8 : i32
    %6 = vector.broadcast %c8_i32 : i32 to vector<32x1xi32>
    %7 = arith.shrsi %0, %6 : vector<32x1xi32>
    %c255_i32_1 = arith.constant 255 : i32
    %8 = vector.broadcast %c255_i32_1 : i32 to vector<32x1xi32>
    %9 = arith.andi %7, %8 : vector<32x1xi32>
    %10 = vector.broadcast %9 : vector<32x1xi32> to vector<32x128xi32>
    %11 = arith.cmpi eq, %1, %10 : vector<32x128xi32>
    %12 = arith.ori %5, %11 : vector<32x128xi1>
    %c16_i32 = arith.constant 16 : i32
    %13 = vector.broadcast %c16_i32 : i32 to vector<32x1xi32>
    %14 = arith.shrsi %0, %13 : vector<32x1xi32>
    %c255_i32_2 = arith.constant 255 : i32
    %15 = vector.broadcast %c255_i32_2 : i32 to vector<32x1xi32>
    %16 = arith.andi %14, %15 : vector<32x1xi32>
    %17 = vector.broadcast %16 : vector<32x1xi32> to vector<32x128xi32>
    %18 = arith.cmpi eq, %1, %17 : vector<32x128xi32>
    %19 = arith.ori %12, %18 : vector<32x128xi1>
    %c0_3 = arith.constant 0 : index
    %c0_4 = arith.constant 0 : index
    %20 = vector.load %arg2[%c0_3, %c0_4] : memref<32x8xbf16, #tpu.memory_space<vmem>>, vector<32x8xbf16>
    %cst = arith.constant 0.000000e+00 : bf16
    %21 = vector.broadcast %cst : bf16 to vector<32x120xbf16>
    %22 = tpu.concatenate %20, %21 in 1 : vector<32x8xbf16>, vector<32x120xbf16> -> vector<32x128xbf16>
    %cst_5 = arith.constant 1.000000e+00 : bf16
    %23 = vector.broadcast %cst_5 : bf16 to vector<32x128xbf16>
    %24 = arith.select %19, %23, %22 : vector<32x128xi1>, vector<32x128xbf16>
    %c0_6 = arith.constant 0 : index
    %c0_7 = arith.constant 0 : index
    %25 = vector.load %arg3[%c0_6, %c0_7] : memref<128x32xbf16, #tpu.memory_space<vmem>>, vector<128x32xbf16>
    %cst_8 = arith.constant dense<0.000000e+00> : vector<32x32xf32>
    %26 = tpu.matmul %24, %25, %cst_8 {dimension_numbers = #tpu.dot_dimension_numbers<[1], [0], [0], [1], [0, 0, 1, 1], [], []>} : vector<32x128xbf16>, vector<128x32xbf16>, vector<32x32xf32> -> vector<32x32xf32>
    %c0_9 = arith.constant 0 : index
    %c0_10 = arith.constant 0 : index
    %27 = vector.load %arg4[%c0_9, %c0_10] : memref<1x32xf32, #tpu.memory_space<vmem>>, vector<1x32xf32>
    %28 = vector.broadcast %27 : vector<1x32xf32> to vector<32x32xf32>
    %29 = arith.addf %26, %28 : vector<32x32xf32>
    %cst_11 = arith.constant 0.000000e+00 : f32
    %30 = vector.broadcast %cst_11 : f32 to vector<32x32xf32>
    %31 = arith.maximumf %29, %30 : vector<32x32xf32>
    %32 = arith.truncf %31 : vector<32x32xf32> to vector<32x32xbf16>
    %c0_12 = arith.constant 0 : index
    %c0_13 = arith.constant 0 : index
    %33 = vector.load %arg5[%c0_12, %c0_13] : memref<32x16xbf16, #tpu.memory_space<vmem>>, vector<32x16xbf16>
    %cst_14 = arith.constant dense<0.000000e+00> : vector<32x16xf32>
    %34 = tpu.matmul %32, %33, %cst_14 {dimension_numbers = #tpu.dot_dimension_numbers<[1], [0], [0], [1], [0, 0, 1, 1], [], []>} : vector<32x32xbf16>, vector<32x16xbf16>, vector<32x16xf32> -> vector<32x16xf32>
    %c0_15 = arith.constant 0 : index
    %c0_16 = arith.constant 0 : index
    %35 = vector.load %arg6[%c0_15, %c0_16] : memref<1x16xf32, #tpu.memory_space<vmem>>, vector<1x16xf32>
    %36 = vector.broadcast %35 : vector<1x16xf32> to vector<32x16xf32>
    %37 = arith.addf %34, %36 : vector<32x16xf32>
    %cst_17 = arith.constant 0.000000e+00 : f32
    %38 = vector.broadcast %cst_17 : f32 to vector<32x16xf32>
    %39 = arith.maximumf %37, %38 : vector<32x16xf32>
    %40 = arith.truncf %39 : vector<32x16xf32> to vector<32x16xbf16>
    %c0_18 = arith.constant 0 : index
    %c0_19 = arith.constant 0 : index
    %41 = vector.load %arg7[%c0_18, %c0_19] : memref<16x2xbf16, #tpu.memory_space<vmem>>, vector<16x2xbf16>
    %cst_20 = arith.constant dense<0.000000e+00> : vector<32x2xf32>
    %42 = tpu.matmul %40, %41, %cst_20 {dimension_numbers = #tpu.dot_dimension_numbers<[1], [0], [0], [1], [0, 0, 1, 1], [], []>} : vector<32x16xbf16>, vector<16x2xbf16>, vector<32x2xf32> -> vector<32x2xf32>
    %c0_21 = arith.constant 0 : index
    %c0_22 = arith.constant 0 : index
    %43 = vector.load %arg8[%c0_21, %c0_22] : memref<1x2xf32, #tpu.memory_space<vmem>>, vector<1x2xf32>
    %44 = vector.broadcast %43 : vector<1x2xf32> to vector<32x2xf32>
    %45 = arith.addf %42, %44 : vector<32x2xf32>
    %c0_23 = arith.constant 0 : index
    %c0_24 = arith.constant 0 : index
    %46 = vector.load %arg9[%c0_23, %c0_24] : memref<32x2xf32, #tpu.memory_space<vmem>>, vector<32x2xf32>
    tpu.vector_store %arg9[%c0_23, %c0_24], %45 {strides = array<i32>} : memref<32x2xf32, #tpu.memory_space<vmem>>, vector<32x2xf32>,
    return
  }
  func.func @transform_0(%arg0: i32) -> (i32, i32) {
    %c0_i32 = arith.constant 0 : i32
    %c0_i32_0 = arith.constant 0 : i32
    return %arg0, %c0_i32 : i32, i32
  }
  func.func @transform_1(%arg0: i32) -> (i32, i32) {
    %c0_i32 = arith.constant 0 : i32
    %c0_i32_0 = arith.constant 0 : i32
    return %arg0, %c0_i32 : i32, i32
  }
  func.func @transform_2(%arg0: i32) -> (i32, i32) {
    %c0_i32 = arith.constant 0 : i32
    %c0_i32_0 = arith.constant 0 : i32
    %c0_i32_1 = arith.constant 0 : i32
    return %c0_i32, %c0_i32_0 : i32, i32
  }
  func.func @transform_3(%arg0: i32) -> (i32, i32) {
    %c0_i32 = arith.constant 0 : i32
    %c0_i32_0 = arith.constant 0 : i32
    %c0_i32_1 = arith.constant 0 : i32
    return %c0_i32, %c0_i32_0 : i32, i32
  }
  func.func @transform_4(%arg0: i32) -> (i32, i32) {
    %c0_i32 = arith.constant 0 : i32
    %c0_i32_0 = arith.constant 0 : i32
    %c0_i32_1 = arith.constant 0 : i32
    return %c0_i32, %c0_i32_0 : i32, i32
  }
  func.func @transform_5(%arg0: i32) -> (i32, i32) {
    %c0_i32 = arith.constant 0 : i32
    %c0_i32_0 = arith.constant 0 : i32
    %c0_i32_1 = arith.constant 0 : i32
    return %c0_i32, %c0_i32_0 : i32, i32
  }
  func.func @transform_6(%arg0: i32) -> (i32, i32) {
    %c0_i32 = arith.constant 0 : i32
    %c0_i32_0 = arith.constant 0 : i32
    %c0_i32_1 = arith.constant 0 : i32
    return %c0_i32, %c0_i32_0 : i32, i32
  }
  func.func @transform_7(%arg0: i32) -> (i32, i32) {
    %c0_i32 = arith.constant 0 : i32
    %c0_i32_0 = arith.constant 0 : i32
    %c0_i32_1 = arith.constant 0 : i32
    return %c0_i32, %c0_i32_0 : i32, i32
  }
  func.func @transform_8(%arg0: i32) -> (i32, i32) {
    %c0_i32 = arith.constant 0 : i32
    %c0_i32_0 = arith.constant 0 : i32
    return %arg0, %c0_i32 : i32, i32
  }
}

</mosaic_0001>

<bundles_post_ra>
// kernel: tpu_custom_call.1
= control target key start
LH: loop header
LB: loop body
LE: loop exit
PB: predicated region body
PF: predicated region fallthrough
CT: control target
= control target key end

     0   :  { %s1242_s27 = smov 0   ;;  %s1244_s28 = smov 0   ;;  %s1393_s0 = inlined_call_operand.vmem [shape: s32[100,1], index: 0, kind: input, shape index: {}]   ;;  %s1394_s1 = inlined_call_operand.vmem [shape: bf16[100,8], index: 1, kind: input, shape index: {}]   ;;  %s1395_s2 = inlined_call_operand.vmem [shape: bf16[128,32], index: 2, kind: input, shape index: {}]   ;;  %s1396_s3 = inlined_call_operand.vmem [shape: f32[1,32], index: 3, kind: input, shape index: {}]   ;;  %s1397_s4 = inlined_call_operand.vmem [shape: bf16[32,16], index: 4, kind: input, shape index: {}]   ;;  %s1398_s5 = inlined_call_operand.vmem [shape: f32[1,16], index: 5, kind: input, shape index: {}]   ;;  %s1399_s6 = inlined_call_operand.vmem [shape: bf16[16,2], index: 6, kind: input, shape index: {}]   ;;  %s1400_s7 = inlined_call_operand.vmem [shape: f32[1,2], index: 7, kind: input, shape index: {}]   ;;  %s1401_s8 = inlined_call_operand.vmem [shape: f32[100,2], index: 8, kind: output, shape index: {}]  }
   0x1   :  { %s1246_s29 = smov 0  }
   0x2 LB: > { %s1255_s30 = sadd.s32 4294967295, %s1162_s29   ;;  %s1257_s9 = sadd.s32 1, %s1162_s29   ;;  %s1162_s29 = sphi %s1246_s29, %s1408_s29   ;;  %s1158_s28 = sphi %s1244_s28, %s1407_s28   ;;  %s1154_s27 = sphi %s1242_s27, %s1406_s27  }
   0x3   : > { %s200_s10 = ssub.s32 %s1162_s29, %s1257_s9  ;;  %s203_s11 = sadd.s32 1, %s1158_s28 }
   0x4   : > { %p201_p0 = scmp.eq.s32.totalorder %s200_s10, 0  ;;  %p213_p1 = scmp.ne.s32.totalorder %s1158_s28, %s1154_s27 }
   0x5   : > { %p214_p2 = scmp.eq.s32.totalorder %s1255_s30, 3  ;;  %p910_p3 = scmp.ge.s32.totalorder %s1162_s29, 1 }
   0x6   : > { %s1265_s12 = scalar_select %p201_p0, %s1158_s28, %s203_s11  }
   0x7   : > { %p1267_p4 = por %p214_p2, %p213_p1  ;;  %p290_p5 = scmp.lt.s32.totalorder %s1162_s29, 5 }
   0x9   : > { %p291_p6 = pnand %p910_p3, %p290_p5 }
   0xa   : > { %s1272_s14 = sshll.u32 (!%p291_p6), %s1255_s30, 2  ;;  %s333_s21 = sand.u32 (!%p291_p6), 1, %s1154_s27  }
   0xb   : > { %294 = sbr.rel (%p291_p6) target bundleno = 636 (0x27c), region = 52  ;;  %p341_p7 = scmp.lt.s32.totalorder (!%p291_p6), %s1272_s14, 12 }
  0x10   : > { %v1196_v0 = vmov 0   ;;  %s1276_s15 = scalar_select %p341_p7, %s1272_s14, 12  ;;  %v998_v25 = vld [vmem:[%s1395_s2 + $0x38] sm:$0xff]  ;;  %v997_v26 = vld [vmem:[%s1395_s2 + $0x30] sm:$0xff]  ;;  %v996_v27 = vld [vmem:[%s1395_s2 + $0x28] sm:$0xff]  ;;  %v375_v34 = vlaneseq  ;;  %vm467_vm4 = vcmask 64512  }
  0x11   : > { %1102 = vset.pattern.permute.xlu0 %v1196_v0  ;;  %1104 = vset.pattern.permute.xlu2 %v1196_v0  ;;  %v995_v28 = vld [vmem:[%s1395_s2 + $0x20] sm:$0xff]  ;;  %v994_v29 = vld [vmem:[%s1395_s2 + $0x18] sm:$0xff]  ;;  %v993_v30 = vld [vmem:[%s1395_s2 + $0x10] sm:$0xff]  ;;  %s675_s27 = ssub.s32 (%p1267_p4), 13, %s1272_s14 }
  0x12   : > { %1103 = vset.pattern.permute.xlu1 %v1196_v0  ;;  %s913_s16 = sshll.u32 %s1276_s15, 3  ;;  %547 = vmatpush.bf16.msra.mxu0 %v998_v25  ;;  %v992_v31 = vld [vmem:[%s1395_s2 + $0x8] sm:$0xff]  ;;  %v991_v32 = vld [vmem:[%s1395_s2] sm:$0xff]  ;;  %v376_v36 = vand.u32 127, %v375_v34  ;;  %s915_s22 = sshll.u32 %s1276_s15, 2 }
  0x13   : > { %s344_s19 = scalar_lea.vmem %s1393_s0, %s913_s16  ;;  %1005 = vmatpush.bf16.msra.mxu3 %v998_v25  ;;  %s358_s25 = scalar_lea.vmem %s1394_s1, %s915_s22  ;;  %v1000_v53 = vld [vmem:[%s1397_s4 + $0x8] sm:$0xff]  ;;  %v999_v54 = vld [vmem:[%s1397_s4] sm:$0xff] }
  0x14   : > { %v371_v1 = vld [vmem:[%s344_s19] sm:$0xff]  ;;  %v372_v5 = vld [vmem:[%s344_s19 + $0x8] sm:$0xff]  ;;  %v373_v13 = vld [vmem:[%s344_s19 + $0x10] sm:$0xff]  ;;  %605 = vmatpush.bf16.msra.mxu1 %v1000_v53  ;;  %s911_s22 = sshll.u32 %s333_s21, 5  ;;  %s1002_s15 = sshll.u32 (%p1267_p4), %s1255_s30, 5 }
  0x15   : > { %v377_v2 = vand.u32 255, %v371_v1  ;;  %v425_v3 = vshra.s32 %v371_v1, 16  ;;  %v397_v4 = vshra.s32 %v371_v1, 8  ;;  %v426_v8 = vshra.s32 %v372_v5, 16  ;;  %v374_v15 = vld [vmem:[%s344_s19 + $0x18] sm:$0xff]  ;;  %v989_v40 = vld [vmem:[%s358_s25] sm:$0xff]  ;;  %s1344_s10 = scalar_lea.vmem (%p1267_p4), %s1401_s8, %s1002_s15  }
  0x16   : > { %v398_v9 = vshra.s32 %v372_v5, 8  ;;  %v378_v10 = vand.u32 255, %v372_v5  ;;  %v399_v14 = vshra.s32 %v373_v13, 8  ;;  %v379_v16 = vand.u32 255, %v373_v13  ;;  %548 = vmatpush.bf16.msra.mxu0 %v997_v26  ;;  %v990_v48 = vld [vmem:[%s358_s25 + $0x8] sm:$0xff]  ;;  %s1331_s25 = scalar_lea.vmem [#allocation2], %s911_s22  }
  0x17   : > { %382 = vperm.xlu0 %1102, %v377_v2   ;;  %v429_v6 = vand.u32 255, %v425_v3  ;;  %v401_v7 = vand.u32 255, %v397_v4  ;;  %v430_v11 = vand.u32 255, %v426_v8  ;;  %v380_v18 = vand.u32 255, %v374_v15  ;;  %1006 = vmatpush.bf16.msra.mxu3 %v997_v26  ;;  %v1105_v56 = vld [vmem:[%s1396_s3] ss:$0 sm:$0xff] }
  0x18   : > { %v402_v12 = vand.u32 255, %v398_v9  ;;  %v403_v17 = vand.u32 255, %v399_v14  ;;  %v400_v19 = vshra.s32 %v374_v15, 8  ;;  %v428_v20 = vshra.s32 %v374_v15, 16  ;;  %606 = vmatpush.bf16.msra.mxu1 %v999_v54  ;;  %v1106_v8 = vld [vmem:[%s1398_s5] ss:$0 sm:$0xff] }
  0x19   : > { %434 = vperm.xlu2 %1104, %v429_v6   ;;  %406 = vperm.xlu1 %1103, %v401_v7   ;;  %v427_v21 = vshra.s32 %v373_v13, 16  ;;  %v470_v42 = vsel %vm467_vm4, %v989_v40, 0  ;;  %v473_v51 = vsel %vm467_vm4, %v990_v48, 0  ;;  %vm592_vm4 = vcmask 261120   ;;  %v1001_v6 = vld [vmem:[%s1399_s6] sm:$0xff]  ;;  %p676_p8 = scmp.lt.s32.totalorder (%p1267_p4), %s675_s27, 4 }
  0x1a   : > { %v404_v22 = vand.u32 255, %v400_v19  ;;  %v432_v23 = vand.u32 255, %v428_v20  ;;  %549 = vmatpush.bf16.msra.mxu0 %v996_v27  ;;  %650 = vmatpush.bf16.msra.mxu2 %v1001_v6 }
  0x1b   : > { %v431_v24 = vand.u32 255, %v427_v21  ;;  %1007 = vmatpush.bf16.msra.mxu3 %v996_v27 }
  0x1e   : > { %550 = vmatpush.bf16.msra.mxu0 %v995_v28 }
  0x1f   : > { %385 = vperm.xlu0 %1102, %v378_v10   ;;  %1008 = vmatpush.bf16.msra.mxu3 %v995_v28 }
  0x21   : > { %437 = vperm.xlu2 %1104, %v430_v11   ;;  %409 = vperm.xlu1 %1103, %v402_v12  }
  0x22   : > { %551 = vmatpush.bf16.msra.mxu0 %v994_v29 }
  0x23   : > { %1009 = vmatpush.bf16.msra.mxu3 %v994_v29 }
  0x26   : > { %552 = vmatpush.bf16.msra.mxu0 %v993_v30 }
  0x27   : > { %388 = vperm.xlu0 %1102, %v379_v16   ;;  %1010 = vmatpush.bf16.msra.mxu3 %v993_v30 }
  0x29   : > { %412 = vperm.xlu2 %1104, %v403_v17   ;;  %391 = vperm.xlu1 %1103, %v380_v18  }
  0x2a   : > { %553 = vmatpush.bf16.msra.mxu0 %v992_v31 }
  0x2b   : > { %1011 = vmatpush.bf16.msra.mxu3 %v992_v31 }
  0x2e   : > { %554 = vmatpush.bf16.msra.mxu0 %v991_v32 }
  0x2f   : > { %415 = vperm.xlu0 %1102, %v404_v22   ;;  %1012 = vmatpush.bf16.msra.mxu3 %v991_v32  ;;  %v1107_v22 = vld [vmem:[%s1400_s7] ss:$0 sm:$0xff] }
  0x31   : > { %443 = vperm.xlu2 %1104, %v432_v23   ;;  %440 = vperm.xlu1 %1103, %v431_v24  }
  0x73   : > { %v435_v33 = vpop.permute.xlu2 %434 }
  0x74   : > { %vm445_vm2 = vcmp.eq.s32.totalorder %v376_v36, %v435_v33 }
  0x7b   : > { %v438_v38 = vpop.permute.xlu2 %437 }
  0x7c   : > { %vm446_vm8 = vcmp.eq.s32.totalorder %v376_v36, %v438_v38 }
  0x83   : > { %v413_v43 = vpop.permute.xlu2 %412 }
  0x84   : > { %vm419_vm13 = vcmp.eq.s32.totalorder %v376_v36, %v413_v43 }
  0x89   : > { %v383_v35 = vpop.permute.xlu0 %382 }
  0x8a   : > { %vm393_vm0 = vcmp.eq.s32.totalorder %v376_v36, %v383_v35 }
  0x8b   : > { %v407_v37 = vpop.permute.xlu1 %406  ;;  %v444_v47 = vpop.permute.xlu2 %443 }
  0x8c   : > { %vm417_vm1 = vcmp.eq.s32.totalorder %v376_v36, %v407_v37 }
  0x8d   : > { %vm421_vm3 = vmor %vm393_vm0, %vm417_vm1  ;;  %vm448_vm1 = vcmp.eq.s32.totalorder %v376_v36, %v444_v47 }
  0x8e   : > { %vm449_vm7 = vmor %vm421_vm3, %vm445_vm2 }
  0x91   : > { %v386_v39 = vpop.permute.xlu0 %385 }
  0x92   : > { %vm394_vm5 = vcmp.eq.s32.totalorder %v376_v36, %v386_v39 }
  0x93   : > { %v410_v41 = vpop.permute.xlu1 %409 }
  0x94   : > { %vm418_vm6 = vcmp.eq.s32.totalorder %v376_v36, %v410_v41 }
  0x95   : > { %vm422_vm9 = vmor %vm394_vm5, %vm418_vm6 }
  0x96   : > { %vm450_vm10 = vmor %vm422_vm9, %vm446_vm8  ;;  %vm636_vm8 = vcmask 130048   ;;  %vm662_vm9 = vcmask 15360  }
  0x97   : > { %vm475_vm11 = vmpackc.low %vm450_vm10, %vm449_vm7 }
  0x98   : > { %v477_v44 = vsel %vm475_vm11, 1065369472, %v470_v42 }
  0x99   : > { %555 = vmatmul.bf16.vlgmr.msra.gmra.mxu0 %v477_v44  ;;  %v389_v45 = vpop.permute.xlu0 %388 }
  0x9a   : > { %vm395_vm12 = vcmp.eq.s32.totalorder %v376_v36, %v389_v45 }
  0x9b   : > { %v392_v46 = vpop.permute.xlu1 %391  ;;  %vm423_vm14 = vmor %vm395_vm12, %vm419_vm13 }
  0x9c   : > { %vm396_vm15 = vcmp.eq.s32.totalorder %v376_v36, %v392_v46 }
  0xa1   : > { %v416_v49 = vpop.permute.xlu0 %415 }
  0xa2   : > { %vm420_vm0 = vcmp.eq.s32.totalorder %v376_v36, %v416_v49 }
  0xa3   : > { %vm424_vm2 = vmor %vm396_vm15, %vm420_vm0  ;;  %v441_v50 = vpop.permute.xlu1 %440 }
  0xa4   : > { %vm447_vm3 = vcmp.eq.s32.totalorder %v376_v36, %v441_v50  ;;  %vm452_vm5 = vmor %vm424_vm2, %vm448_vm1 }
  0xa5   : > { %vm451_vm6 = vmor %vm423_vm14, %vm447_vm3 }
  0xa6   : > { %vm476_vm7 = vmpackc.low %vm452_vm5, %vm451_vm6 }
  0xa7   : > { %v478_v52 = vsel %vm476_vm7, 1065369472, %v473_v51 }
  0xa8   : > { %560 = vmatmul.bf16.vlgmr.msra.gmra.mxu3 %v478_v52 }
 0x116   : > { %v556_v55 = vpop.f32.mrf.mxu0 }
 0x117   : > { %v557_v57 = vadd.f32 %v1105_v56, %v556_v55 }
 0x119   : > { %v566_v60 = vmax.f32 %v557_v57, 0.0 }
 0x11e   : > { %v558_v58 = vpop.f32.mrf.mxu0 }
 0x11f   : > { %v559_v59 = vadd.f32 %v1105_v56, %v558_v58 }
 0x121   : > { %v567_v61 = vmax.f32 %v559_v59, 0.0 }
 0x123   : > { %v570_v62 = vpack.c.bf16 %v567_v61, %v566_v60 }
 0x125   : > { %964 = vmatmul.msk.bf16.vlgmr.msra.gmra.mxu1 %vm592_vm4, %v570_v62 }
 0x12b   : > { %v561_v63 = vpop.f32.mrf.mxu3 }
 0x12c   : > { %v562_v0 = vadd.f32 %v1105_v56, %v561_v63 }
 0x12e   : > { %v568_v3 = vmax.f32 %v562_v0, 0.0 }
 0x133   : > { %v563_v1 = vpop.f32.mrf.mxu3 }
 0x134   : > { %v564_v2 = vadd.f32 %v1105_v56, %v563_v1 }
 0x136   : > { %v569_v4 = vmax.f32 %v564_v2, 0.0 }
 0x138   : > { %v571_v5 = vpack.c.bf16 %v569_v4, %v568_v3 }
 0x13a   : > { %965 = vmatmul.msk.bf16.gmra.mxu1 %vm592_vm4, %v571_v5 }
 0x1a2   : > { %v608_v7 = vpop.f32.mrf.mxu1 }
 0x1a3   : > { %v609_v9 = vadd.f32 %v1106_v8, %v608_v7 }
 0x1a5   : > { %v618_v12 = vmax.f32 %v609_v9, 0.0 }
 0x1aa   : > { %v610_v10 = vpop.f32.mrf.mxu1 }
 0x1ab   : > { %v611_v11 = vadd.f32 %v1106_v8, %v610_v10 }
 0x1ad   : > { %v619_v13 = vmax.f32 %v611_v11, 0.0 }
 0x1af   : > { %v622_v14 = vpack.c.bf16 %v619_v13, %v618_v12 }
 0x1b1   : > { %970 = vmatmul.msk.bf16.vlgmr.msra.gmra.mxu2 %vm636_vm8, %v622_v14 }
 0x1b7   : > { %v613_v15 = vpop.f32.mrf.mxu1 }
 0x1b8   : > { %v614_v16 = vadd.f32 %v1106_v8, %v613_v15 }
 0x1ba   : > { %v620_v19 = vmax.f32 %v614_v16, 0.0 }
 0x1bf   : > { %v615_v17 = vpop.f32.mrf.mxu1 }
 0x1c0   : > { %v616_v18 = vadd.f32 %v1106_v8, %v615_v17 }
 0x1c2   : > { %v621_v20 = vmax.f32 %v616_v18, 0.0 }
 0x1c4   : > { %v623_v21 = vpack.c.bf16 %v621_v20, %v620_v19 }
 0x1c6   : > { %971 = vmatmul.msk.bf16.gmra.mxu2 %vm636_vm8, %v623_v21 }
 0x234   : > { %v652_v23 = vpop.f32.mrf.mxu2 }
 0x235   : > { %v653_v24 = vadd.f32 %v1107_v22, %v652_v23 }
 0x237   : > { %663 = vst.msk [vmem:[%s1331_s25] sm:$0xff] %vm662_vm9, %v653_v24 }
 0x23c   : > { %v654_v25 = vpop.f32.mrf.mxu2 }
 0x23d   : > { %v655_v26 = vadd.f32 %v1107_v22, %v654_v25 }
 0x23f   : > { %664 = vst.msk [vmem:[%s1331_s25 + $0x8] sm:$0xff] %vm662_vm9, %v655_v26 }
 0x249   : > { %v657_v27 = vpop.f32.mrf.mxu2 }
 0x24a   : > { %v658_v28 = vadd.f32 %v1107_v22, %v657_v27 }
 0x24c   : > { %665 = vst.msk [vmem:[%s1331_s25 + $0x10] sm:$0xff] %vm662_vm9, %v658_v28 }
 0x250   : > { %673 = sbr.rel (!%p1267_p4) target bundleno = 636 (0x27c), region = 56 }
 0x251   : > { %v659_v29 = vpop.f32.mrf.mxu2 }
 0x252   : > { %v660_v30 = vadd.f32 %v1107_v22, %v659_v29 }
 0x254   : > { %666 = vst.msk [vmem:[%s1331_s25 + $0x18] sm:$0xff] %vm662_vm9, %v660_v30 }
 0x255   : > { %s1410_s27 = smov (!%p676_p8, %s675_s27), 4 }
 0x256   : > { %s974_s11 = sshll.u32 %s1410_s27, 3 }
 0x257   : > { %p977_p9 = scmp.eq.s32.totalorder %s974_s11, 0 }
 0x258   : > { %s1350_s16 = sshrl.u32 (!%p977_p9), %s1410_s27, 2 }
 0x259   : > { %684 = sbr.rel (%p977_p9) target bundleno = 636 (0x27c), region = 60  ;;  %p978_p10 = scmp.le.s32.totalorder (!%p977_p9), %s1350_s16, 0 }
 0x25e   : > { %857 = sbr.rel (%p978_p10) target bundleno = 619 (0x26b), region = 139  ;;  %s1403_s30 = smov (!%p978_p10), %s1344_s10 }
 0x25f   : > { %s1404_s13 = smov (!%p978_p10), %s1331_s25  ;;  %s1359_s14 = smov (!%p978_p10), 0  }
 0x260   : > { %s1176_s17 = smov (!%p978_p10), 0  }
 0x263 LB: >> { %v753_v31 = vld [vmem:[%s1170_s13] sm:$0xff]  ;;  %v755_v32 = vld [vmem:[%s1170_s13 + $0x8] sm:$0xff]  ;;  %v757_v33 = vld [vmem:[%s1170_s13 + $0x10] sm:$0xff]  ;;  %s761_s18 = sadd.s32 1, %s1174_s14  ;;  %s747_s17 = sadd.s32 1, %s1178_s17   ;;  %s1178_s17 = sphi %s1176_s17, %s747_s17   ;;  %s1174_s14 = sphi %s1359_s14, %s1405_s14   ;;  %s1170_s13 = sphi %s1404_s13, %s766_s13   ;;  %s1166_s30 = sphi %s1403_s30, %s767_s30  }
 0x264   : >> { %754 = vst [vmem:[%s1166_s30] sm:$0xff] %v753_v31  ;;  %v759_v34 = vld [vmem:[%s1170_s13 + $0x18] sm:$0xff]  ;;  %p762_p11 = scmp.ge.s32.totalorder %s761_s18, %s1350_s16  ;;  %p746_p12 = scmp.ge.s32.totalorder %s747_s17, %s1350_s16 }
 0x265   : >> { %756 = vst [vmem:[%s1166_s30 + $0x8] sm:$0xff] %v755_v32 }
 0x266   : >> { %758 = vst [vmem:[%s1166_s30 + $0x10] sm:$0xff] %v757_v33  ;;  %s1412_s18 = smov (%p762_p11, %s761_s18), 0  ;;  %749 = sbr.rel (!%p746_p12) target bundleno = 611 (0x263), region = 145 }
 0x267   : >> { %760 = vst [vmem:[%s1166_s30 + $0x18] sm:$0xff] %v759_v34  ;;  %s979_s19 = sshll.u32 %s1412_s18, 5  ;;  %s1405_s14 = smov %s1412_s18 }
 0x268   : >> { %s766_s13 = scalar_lea.vmem %s1331_s25, %s979_s19 [#allocation2]   ;;  %s767_s30 = scalar_lea.vmem %s1344_s10, %s979_s19  }
 0x26b PF: > { %s1375_s20 = sand.u32 3, %s1410_s27   ;;  %s1003_s21 = sshll.u32 %s1350_s16, 5 }
 0x26c   : > { %s772_s22 = scalar_lea.vmem %s1331_s25, %s1003_s21 [#allocation2]   ;;  %s774_s23 = scalar_lea.vmem %s1344_s10, %s1003_s21  }
 0x26d   : > { %p984_p13 = scmp.le.s32.totalorder %s1375_s20, 0 }
 0x26e   : > { %s1180_s24 = smov (!%p984_p13), %s774_s23   ;;  %s1184_s15 = smov (!%p984_p13), %s772_s22  }
 0x26f   : > { %871 = sbr.rel (%p984_p13) target bundleno = 636 (0x27c), region = 150  ;;  %s1188_s26 = smov (!%p984_p13), 0  }
 0x270   : > { %s1192_s29 = smov (!%p984_p13), 0  }
 0x274 LB: >> { %v784_v35 = vld [vmem:[%s1186_s15] sm:$0xff]  ;;  %s786_s27 = sadd.s32 1, %s1190_s26  ;;  %s778_s29 = sadd.s32 1, %s1194_s29   ;;  %s1194_s29 = sphi %s1192_s29, %s778_s29   ;;  %s1190_s26 = sphi %s1188_s26, %s1189_s26   ;;  %s1186_s15 = sphi %s1184_s15, %s791_s15   ;;  %s1182_s24 = sphi %s1180_s24, %s792_s24  }
 0x275   : >> { %785 = vst [vmem:[%s1182_s24] sm:$0xff] %v784_v35  ;;  %p787_p0 = scmp.ge.s32.totalorder %s786_s27, %s1375_s20  ;;  %p777_p1 = scmp.ge.s32.totalorder %s778_s29, %s1375_s20 }
 0x277   : >> { %s1414_s27 = smov (%p787_p0, %s786_s27), 0  ;;  %780 = sbr.rel (!%p777_p1) target bundleno = 628 (0x274), region = 156 }
 0x278   : >> { %s985_s25 = sshll.u32 %s1414_s27, 3  ;;  %s1189_s26 = smov %s1414_s27  }
 0x279   : >> { %s791_s15 = scalar_lea.vmem %s772_s22, %s985_s25 [#allocation2]   ;;  %s792_s24 = scalar_lea.vmem %s774_s23, %s985_s25  }
 0x27c PF: > { %p15_p2 = scmp.ge.s32.totalorder %s1257_s9, 6   ;;  %s1406_s27 = smov %s1158_s28 }
 0x27d   : > { %s1407_s28 = smov %s1265_s12  ;;  %s1408_s29 = smov %s1257_s9 }
 0x27e   :  { %17 = sbr.rel (!%p15_p2) target bundleno = 2 (0x2), region = 167 }

</bundles_post_ra>
